<compile_context>
chip_gen: v5e
topology: v5e:2x2
jax: 0.10.0
libtpu: 0.0.40
codegen_flags: <defaults>
</compile_context>

<pallas_src>
import jax
import jax.numpy as jnp
from jax.experimental import pallas as pl
from jax.experimental.pallas import tpu as pltpu


def _round_up(n, m):
    return ((n + m - 1) // m) * m


def dan_kernel(x_ref, w1_ref, b1_ref, w2_ref, b2_ref, o_ref):
    # Layer 1: [TB, D] f32 x-tile, cast to bf16 in-register for the MXU;
    # accumulate in f32, add bias, ReLU.
    x = x_ref[...].astype(jnp.bfloat16)
    h = jnp.dot(x, w1_ref[...], preferred_element_type=jnp.float32)
    h = jnp.maximum(h + b1_ref[...], 0.0)
    # TODO(synk): nn.Dropout is identity in eval mode; training-mode dropout
    # (pltpu.prng_seed + pltpu.stateful_bernoulli) intentionally not applied.
    # Layer 2: [TB, H] -> [TB, Cp]; padded class slots carry a -1e30 bias.
    logits = jnp.dot(h.astype(jnp.bfloat16), w2_ref[...],
                     preferred_element_type=jnp.float32)
    logits = logits + b2_ref[...]
    # Numerically stable softmax over the lane-dense (128-wide) class axis,
    # all in f32; only the final probabilities are cast to the bf16 output.
    m = jnp.max(logits, axis=-1, keepdims=True)
    e = jnp.exp(logits - m)                       # exp(-1e30 - m) == 0 for pads
    s = jnp.sum(e, axis=-1, keepdims=True)
    probs = e * pl.reciprocal(s, approx=True)
    o_ref[...] = probs.astype(o_ref.dtype)


def prepare_dan_params(w1, b1, w2, b2):
    """One-time weight prep (padding + bf16 cast), hoisted out of the forward.

    w1: [D, H], b1: [1, H], w2: [H, C], b2: [1, C], all f32, stored [in, out].
    """
    D, H = w1.shape
    C = w2.shape[1]
    Cp = _round_up(max(C, 128), 128)          # lane-dense class axis (3 -> 128)

    w1_bf = w1.astype(jnp.bfloat16)           # [D, H]  (D left unpadded)
    w2_bf = jnp.zeros((H, Cp), jnp.bfloat16).at[:, :C].set(
        w2.astype(jnp.bfloat16))
    # Padded class slots get -1e30 so they receive exactly zero softmax mass.
    b2_p = jnp.full((1, Cp), -1e30, jnp.float32).at[:, :C].set(b2)
    b1_f = b1.astype(jnp.float32)

    return dict(w1=w1_bf, b1=b1_f, w2=w2_bf, b2=b2_p, D=D, H=H, C=C, Cp=Cp)


def dan_forward(x, params, *, tb=1024):
    """x: [B, D] float32 (unpadded). params: output of prepare_dan_params."""
    B, D = x.shape
    assert D == params["D"]
    H, C, Cp = params["H"], params["C"], params["Cp"]

    TB = min(tb, _round_up(B, 8))             # row tile, multiple of 8
    grid = (pl.cdiv(B, TB),)                  # ragged last block handled by Pallas

    flops = 2 * B * (D * H + H * Cp)
    bytes_accessed = (B * D * 4                # x read (f32)
                      + B * Cp * 2             # bf16 probability store
                      + D * H * 2 + H * 4      # w1 (bf16) + b1 (f32)
                      + H * Cp * 2 + Cp * 4)   # w2 (bf16) + b2 (f32)
    transcendentals = B * (Cp + 1)             # exp per class + reciprocal

    out_p = pl.pallas_call(
        dan_kernel,
        out_shape=jax.ShapeDtypeStruct((B, Cp), jnp.bfloat16),
        grid=grid,
        in_specs=[
            pl.BlockSpec((TB, D), lambda i: (i, 0)),   # x: tiled over batch
            pl.BlockSpec((D, H), lambda i: (0, 0)),    # w1: resident
            pl.BlockSpec((1, H), lambda i: (0, 0)),    # b1: resident
            pl.BlockSpec((H, Cp), lambda i: (0, 0)),   # w2: resident
            pl.BlockSpec((1, Cp), lambda i: (0, 0)),   # b2: resident
        ],
        out_specs=pl.BlockSpec((TB, Cp), lambda i: (i, 0)),
        compiler_params=pltpu.CompilerParams(
            dimension_semantics=("parallel",)   # megacore on v7x, neutral else
        ),
        cost_estimate=pl.CostEstimate(
            flops=flops,
            transcendentals=transcendentals,
            bytes_accessed=bytes_accessed,
        ),
    )(x, params["w1"], params["b1"], params["w2"], params["b2"])

    # Tiny epilogue: slice the 3 real classes and hand back f32 probabilities.
    return out_p[:B, :C].astype(jnp.float32)


def init_params(key, d=300, hidden=128, n_classes=3):
    """Deterministic init mimicking nn.Linear's uniform(-1/sqrt(fan_in), +)."""
    k1, k2, k3, k4 = jax.random.split(key, 4)
    bound1 = 1.0 / jnp.sqrt(d)
    bound2 = 1.0 / jnp.sqrt(hidden)
    # Stored as [in, out] (transpose of PyTorch's [out, in]) so kernel does x @ W.
    w1 = jax.random.uniform(k1, (d, hidden), jnp.float32, -bound1, bound1)
    b1 = jax.random.uniform(k2, (1, hidden), jnp.float32, -bound1, bound1)
    w2 = jax.random.uniform(k3, (hidden, n_classes), jnp.float32, -bound2, bound2)
    b2 = jax.random.uniform(k4, (1, n_classes), jnp.float32, -bound2, bound2)
    return w1, b1, w2, b2


if __name__ == "__main__":
    d, hidden, n_classes = 300, 128, 3
    batch = 64

    key = jax.random.PRNGKey(0)
    k_params, k_x = jax.random.split(key)
    w1, b1, w2, b2 = init_params(k_params, d, hidden, n_classes)
    x = jax.random.normal(k_x, (batch, d), jnp.float32)

    # One-time weight prep, then the kernel forward.
    params = prepare_dan_params(w1, b1, w2, b2)
    out = dan_forward(x, params)
    out = jax.block_until_ready(out)

    # Reference in plain JAX, applying the same bf16 quantization of the
    # matmul operands (f32 accumulation), eval-mode dropout.
    xq = x.astype(jnp.bfloat16).astype(jnp.float32)
    w1q = w1.astype(jnp.bfloat16).astype(jnp.float32)
    w2q = w2.astype(jnp.bfloat16).astype(jnp.float32)
    h_ref = jnp.maximum(xq @ w1q + b1, 0.0)
    hq = h_ref.astype(jnp.bfloat16).astype(jnp.float32)
    logits_ref = hq @ w2q + b2
    ref = jax.nn.softmax(logits_ref, axis=-1)

    assert out.shape == (batch, n_classes)
    # Tolerances account for bf16 matmuls, bf16 probability store, and the
    # approx (EUP) reciprocal in the softmax denominator.
    assert jnp.allclose(out, ref, atol=2e-2, rtol=2e-2)
    assert jnp.allclose(jnp.sum(out, axis=-1), 1.0, atol=2e-2)
    assert bool(jnp.all(out >= 0.0))

    print("KERNEL_OK")
</pallas_src>

<mosaic_0001>
module attributes {stable_mosaic.version = 11 : i64} {
  func.func @dan_kernel(%arg0: i32, %arg1: memref<64x300xf32, #tpu.memory_space<vmem>>, %arg2: memref<300x128xbf16, #tpu.memory_space<vmem>>, %arg3: memref<1x128xf32, #tpu.memory_space<vmem>>, %arg4: memref<128x128xbf16, #tpu.memory_space<vmem>>, %arg5: memref<1x128xf32, #tpu.memory_space<vmem>>, %arg6: memref<64x128xbf16, #tpu.memory_space<vmem>>) attributes {dimension_semantics = [#tpu.dimension_semantics<parallel>], iteration_bounds = array<i64: 1>, scalar_prefetch = 0 : i64, scratch_operands = 0 : i64, tpu.core_type = #tpu.core_type<tc>, window_params = [{transform_indices = @transform_0, window_bounds = array<i64: 64, 300>}, {pipeline_mode = #tpu.pipeline_mode<synchronous>, transform_indices = @transform_1, window_bounds = array<i64: 300, 128>}, {pipeline_mode = #tpu.pipeline_mode<synchronous>, transform_indices = @transform_2, window_bounds = array<i64: 1, 128>}, {pipeline_mode = #tpu.pipeline_mode<synchronous>, transform_indices = @transform_3, window_bounds = array<i64: 128, 128>}, {pipeline_mode = #tpu.pipeline_mode<synchronous>, transform_indices = @transform_4, window_bounds = array<i64: 1, 128>}, {transform_indices = @transform_5, window_bounds = array<i64: 64, 128>}]} {
    %c0 = arith.constant 0 : index
    %c0_0 = arith.constant 0 : index
    %0 = vector.load %arg1[%c0, %c0_0] : memref<64x300xf32, #tpu.memory_space<vmem>>, vector<64x300xf32>
    %1 = arith.truncf %0 : vector<64x300xf32> to vector<64x300xbf16>
    %c0_1 = arith.constant 0 : index
    %c0_2 = arith.constant 0 : index
    %2 = vector.load %arg2[%c0_1, %c0_2] : memref<300x128xbf16, #tpu.memory_space<vmem>>, vector<300x128xbf16>
    %cst = arith.constant dense<0.000000e+00> : vector<64x128xf32>
    %3 = tpu.matmul %1, %2, %cst {dimension_numbers = #tpu.dot_dimension_numbers<[1], [0], [0], [1], [0, 0, 1, 1], [], []>} : vector<64x300xbf16>, vector<300x128xbf16>, vector<64x128xf32> -> vector<64x128xf32>
    %c0_3 = arith.constant 0 : index
    %c0_4 = arith.constant 0 : index
    %4 = vector.load %arg3[%c0_3, %c0_4] : memref<1x128xf32, #tpu.memory_space<vmem>>, vector<1x128xf32>
    %5 = vector.broadcast %4 : vector<1x128xf32> to vector<64x128xf32>
    %6 = arith.addf %3, %5 : vector<64x128xf32>
    %cst_5 = arith.constant 0.000000e+00 : f32
    %7 = vector.broadcast %cst_5 : f32 to vector<64x128xf32>
    %8 = arith.maximumf %6, %7 : vector<64x128xf32>
    %9 = arith.truncf %8 : vector<64x128xf32> to vector<64x128xbf16>
    %c0_6 = arith.constant 0 : index
    %c0_7 = arith.constant 0 : index
    %10 = vector.load %arg4[%c0_6, %c0_7] : memref<128x128xbf16, #tpu.memory_space<vmem>>, vector<128x128xbf16>
    %cst_8 = arith.constant dense<0.000000e+00> : vector<64x128xf32>
    %11 = tpu.matmul %9, %10, %cst_8 {dimension_numbers = #tpu.dot_dimension_numbers<[1], [0], [0], [1], [0, 0, 1, 1], [], []>} : vector<64x128xbf16>, vector<128x128xbf16>, vector<64x128xf32> -> vector<64x128xf32>
    %c0_9 = arith.constant 0 : index
    %c0_10 = arith.constant 0 : index
    %12 = vector.load %arg5[%c0_9, %c0_10] : memref<1x128xf32, #tpu.memory_space<vmem>>, vector<1x128xf32>
    %13 = vector.broadcast %12 : vector<1x128xf32> to vector<64x128xf32>
    %14 = arith.addf %11, %13 : vector<64x128xf32>
    %cst_11 = arith.constant dense<0xFF800000> : vector<64xf32>
    %15 = vector.multi_reduction <maximumf>, %14, %cst_11 [1] : vector<64x128xf32> to vector<64xf32>
    %16 = vector.shape_cast %15 : vector<64xf32> to vector<64x1xf32>
    %17 = vector.broadcast %16 : vector<64x1xf32> to vector<64x128xf32>
    %18 = arith.subf %14, %17 : vector<64x128xf32>
    %19 = math.exp %18 : vector<64x128xf32>
    %cst_12 = arith.constant dense<0.000000e+00> : vector<64xf32>
    %20 = vector.multi_reduction <add>, %19, %cst_12 [1] : vector<64x128xf32> to vector<64xf32>
    %21 = vector.shape_cast %20 : vector<64xf32> to vector<64x1xf32>
    %22 = tpu.reciprocal %21 {approx = true} : vector<64x1xf32> -> vector<64x1xf32>
    %23 = vector.broadcast %22 : vector<64x1xf32> to vector<64x128xf32>
    %24 = arith.mulf %19, %23 : vector<64x128xf32>
    %25 = arith.truncf %24 : vector<64x128xf32> to vector<64x128xbf16>
    %c0_13 = arith.constant 0 : index
    %c0_14 = arith.constant 0 : index
    %26 = vector.load %arg6[%c0_13, %c0_14] : memref<64x128xbf16, #tpu.memory_space<vmem>>, vector<64x128xbf16>
    tpu.vector_store %arg6[%c0_13, %c0_14], %25 {strides = array<i32>} : memref<64x128xbf16, #tpu.memory_space<vmem>>, vector<64x128xbf16>,
    return
  }
  func.func @transform_0(%arg0: i32) -> (i32, i32) {
    %c0_i32 = arith.constant 0 : i32
    %c0_i32_0 = arith.constant 0 : i32
    return %arg0, %c0_i32 : i32, i32
  }
  func.func @transform_1(%arg0: i32) -> (i32, i32) {
    %c0_i32 = arith.constant 0 : i32
    %c0_i32_0 = arith.constant 0 : i32
    %c0_i32_1 = arith.constant 0 : i32
    return %c0_i32, %c0_i32_0 : i32, i32
  }
  func.func @transform_2(%arg0: i32) -> (i32, i32) {
    %c0_i32 = arith.constant 0 : i32
    %c0_i32_0 = arith.constant 0 : i32
    %c0_i32_1 = arith.constant 0 : i32
    return %c0_i32, %c0_i32_0 : i32, i32
  }
  func.func @transform_3(%arg0: i32) -> (i32, i32) {
    %c0_i32 = arith.constant 0 : i32
    %c0_i32_0 = arith.constant 0 : i32
    %c0_i32_1 = arith.constant 0 : i32
    return %c0_i32, %c0_i32_0 : i32, i32
  }
  func.func @transform_4(%arg0: i32) -> (i32, i32) {
    %c0_i32 = arith.constant 0 : i32
    %c0_i32_0 = arith.constant 0 : i32
    %c0_i32_1 = arith.constant 0 : i32
    return %c0_i32, %c0_i32_0 : i32, i32
  }
  func.func @transform_5(%arg0: i32) -> (i32, i32) {
    %c0_i32 = arith.constant 0 : i32
    %c0_i32_0 = arith.constant 0 : i32
    return %arg0, %c0_i32 : i32, i32
  }
}

</mosaic_0001>

<bundles_post_ra>
// kernel: tpu_custom_call.1
= control target key start
LH: loop header
LB: loop body
LE: loop exit
PB: predicated region body
PF: predicated region fallthrough
CT: control target
= control target key end

     0   :  { %10 = vsyncpa [#allocation3], 0  ;;  %s956_s0 = inlined_call_operand.hbm [shape: f32[64,300], index: 0, kind: input, shape index: {}]   ;;  %s957_s1 = inlined_call_operand.hbm [shape: bf16[300,128], index: 1, kind: input, shape index: {}]   ;;  %s958_s2 = inlined_call_operand.vmem [shape: f32[1,128], index: 2, kind: input, shape index: {}]   ;;  %s959_s3 = inlined_call_operand.hbm [shape: bf16[128,128], index: 3, kind: input, shape index: {}]   ;;  %s960_s4 = inlined_call_operand.vmem [shape: f32[1,128], index: 4, kind: input, shape index: {}]   ;;  %s961_s5 = inlined_call_operand.hbm [shape: bf16[64,128], index: 5, kind: output, shape index: {}]  }
   0x1   :  { %11 = vsyncpa [#allocation6], 0  ;;  %s30_s20 = sshll.u32 %s957_s1, 4  ;;  %s31_s20 = int_to_ptr.hbm [resolvable:$true] %s30_s20 }
   0x2   :  { %12 = vsyncpa [#allocation4], 0  ;;  %s887_s21 = smov [#allocation5]   ;;  %s17_s25 = sshll.u32 %s956_s0, 4  ;;  %s18_s25 = int_to_ptr.hbm [resolvable:$true] %s17_s25 }
   0x3   :  { %s32_s22 = sshll.u32 %s887_s21, 4  ;;  %s888_s26 = smov 64   ;;  %s33_s22 = int_to_ptr.vmem [resolvable:$true] %s32_s22 }
   0x4   :  { %s889_s27 = smov 4   ;;  %s890_s28 = smov [#allocation2]  }
   0x5   :  { %38 = dma.hbm_to_vmem [thread:$0]  %s31_s20, 2432, %s33_s22, [#allocation6], %s888_s26, %s888_s26, %s889_s27  }
   0x6   :  { %s19_s29 = sshll.u32 %s890_s28, 4  ;;  %s891_s1 = smov 384   ;;  %s20_s29 = int_to_ptr.vmem [resolvable:$true] %s19_s29 }
   0x7   :  { %s892_s30 = smov 24   ;;  %s45_s8 = sshll.u32 %s959_s3, 4  ;;  %s46_s8 = int_to_ptr.hbm [resolvable:$true] %s45_s8 }
   0x8   :  { %25 = dma.hbm_to_vmem [thread:$0]  %s18_s25, 3072, %s20_s29, [#allocation3], %s891_s1, %s891_s1, %s892_s30  }
   0x9   :  { %s893_s9 = smov [#allocation7]  }
   0xa   :  { %s47_s0 = sshll.u32 %s893_s9, 4  ;;  %s48_s0 = int_to_ptr.vmem [resolvable:$true] %s47_s0 }
   0xb   :  { %53 = dma.hbm_to_vmem [thread:$0]  %s46_s8, 1024, %s48_s0, [#allocation6], %s888_s26, %s888_s26, %s889_s27  }
   0xc   :  { %881 = dma.done.wait [#allocation3], 3072  }
   0xd   :  { %882 = vsyncadd [#allocation3], 4294964224 }
   0xe   :  { %883 = dma.done.wait [#allocation6], 3456  }
   0xf   :  { %884 = vsyncadd [#allocation6], 4294963840  ;;  %v700_v0 = vld [vmem:[#allocation5 + $0x38] sm:$0xff]  ;;  %v699_v2 = vld [vmem:[#allocation5 + $0x30] sm:$0xff]  ;;  %vm273_vm0 = vcmask 1045504   ;;  %vm260_vm1 = vcmask 359424  }
  0x10   :  { %v708_v1 = vld [vmem:[#allocation5 + $0x78] sm:$0xff]  ;;  %277 = vmatpush.bf16.msra.mxu0 %v700_v0  ;;  %v707_v3 = vld [vmem:[#allocation5 + $0x70] sm:$0xff]  ;;  %v698_v8 = vld [vmem:[#allocation5 + $0x28] sm:$0xff]  ;;  %s567_s15 = sshll.u32 %s961_s5, 4  ;;  %s568_s15 = int_to_ptr.hbm [resolvable:$true] %s567_s15 }
  0x11   :  { %306 = vmatpush.bf16.msra.mxu1 %v708_v1  ;;  %v655_v4 = vld [vmem:[#allocation5 + $0x90] sm:$0xf]  ;;  %v711_v5 = vld [vmem:[#allocation5 + $0x90] sm:$0x30]  ;;  %v706_v9 = vld [vmem:[#allocation5 + $0x68] sm:$0xff] }
  0x12   :  { %v656_v6 = vor.u32 %v711_v5, %v655_v4  ;;  %v710_v10 = vld [vmem:[#allocation5 + $0x88] sm:$0xff]  ;;  %v697_v11 = vld [vmem:[#allocation5 + $0x20] sm:$0xff]  ;;  %v71_v14 = vld [vmem:[#allocation2 + $0x10] sm:$0xff] }
  0x13   :  { %v705_v12 = vld [vmem:[#allocation5 + $0x60] sm:$0xff]  ;;  %v74_v15 = vld [vmem:[#allocation2 + $0x28] sm:$0xff]  ;;  %v696_v16 = vld [vmem:[#allocation5 + $0x18] sm:$0xff] }
  0x14   :  { %v275_v7 = vsel %vm273_vm0, %v656_v6, 0  ;;  %278 = vmatpush.bf16.msra.mxu0 %v699_v2  ;;  %v709_v13 = vld [vmem:[#allocation5 + $0x80] sm:$0xff]  ;;  %v704_v17 = vld [vmem:[#allocation5 + $0x58] sm:$0xff]  ;;  %v95_v18 = vpack.c.bf16 %v74_v15, %v71_v14  ;;  %v695_v19 = vld [vmem:[#allocation5 + $0x10] sm:$0xff] }
  0x15   :  { %307 = vmatpush.bf16.msra.mxu1 %v707_v3  ;;  %340 = vmatpush.bf16.msra.mxu2 %v275_v7  ;;  %v703_v20 = vld [vmem:[#allocation5 + $0x50] sm:$0xff]  ;;  %v694_v21 = vld [vmem:[#allocation5 + $0x8] sm:$0xff]  ;;  %v693_v23 = vld [vmem:[#allocation5] sm:$0xff] }
  0x16   :  { %v702_v22 = vld [vmem:[#allocation5 + $0x48] sm:$0xff]  ;;  %v701_v24 = vld [vmem:[#allocation5 + $0x40] sm:$0xff]  ;;  %v72_v26 = vld [vmem:[#allocation2 + $0x18] sm:$0xff] }
  0x17   :  { %v69_v25 = vld [vmem:[#allocation2] sm:$0xff]  ;;  %v70_v27 = vld [vmem:[#allocation2 + $0x8] sm:$0xff]  ;;  %v80_v30 = vld [vmem:[#allocation2 + $0x58] sm:$0xff] }
  0x18   :  { %279 = vmatpush.bf16.msra.mxu0 %v698_v8  ;;  %v73_v28 = vld [vmem:[#allocation2 + $0x20] sm:$0xff]  ;;  %v93_v31 = vpack.c.bf16 %v72_v26, %v69_v25  ;;  %v75_v34 = vld [vmem:[#allocation2 + $0x30] sm:$0xff]  ;;  %v78_v35 = vld [vmem:[#allocation2 + $0x48] sm:$0xff] }
  0x19   :  { %308 = vmatpush.bf16.msra.mxu1 %v706_v9  ;;  %341 = vmatpush.bf16.msra.mxu2 %v710_v10  ;;  %v77_v29 = vld [vmem:[#allocation2 + $0x40] sm:$0xff]  ;;  %v94_v32 = vpack.c.bf16 %v73_v28, %v70_v27  ;;  %v76_v36 = vld [vmem:[#allocation2 + $0x38] sm:$0xff]  ;;  %v79_v37 = vld [vmem:[#allocation2 + $0x50] sm:$0xff]  ;;  %v96_v40 = vpack.c.bf16 %v78_v35, %v75_v34 }
  0x1a   :  { %v98_v33 = vpack.c.bf16 %v80_v30, %v77_v29  ;;  %v83_v38 = vld [vmem:[#allocation2 + $0x70] sm:$0xff]  ;;  %v86_v39 = vld [vmem:[#allocation2 + $0x88] sm:$0xff]  ;;  %v97_v41 = vpack.c.bf16 %v79_v37, %v76_v36  ;;  %v81_v45 = vld [vmem:[#allocation2 + $0x60] sm:$0xff] }
  0x1b   :  { %v101_v42 = vpack.c.bf16 %v86_v39, %v83_v38  ;;  %v719_v43 = vld [vmem:[#allocation7 + $0x38] sm:$0xff]  ;;  %v718_v44 = vld [vmem:[#allocation7 + $0x30] sm:$0xff]  ;;  %v84_v46 = vld [vmem:[#allocation2 + $0x78] sm:$0xff] }
  0x1c   :  { %280 = vmatpush.bf16.msra.mxu0 %v697_v11  ;;  %444 = vmatpush.bf16.msra.mxu3 %v719_v43  ;;  %v82_v47 = vld [vmem:[#allocation2 + $0x68] sm:$0xff]  ;;  %v85_v48 = vld [vmem:[#allocation2 + $0x80] sm:$0xff]  ;;  %v92_v50 = vld [vmem:[#allocation2 + $0xb8] sm:$0xff]  ;;  %v99_v51 = vpack.c.bf16 %v84_v46, %v81_v45 }
  0x1d   :  { %309 = vmatpush.bf16.msra.mxu1 %v705_v12  ;;  %342 = vmatpush.bf16.msra.mxu2 %v709_v13  ;;  %v89_v49 = vld [vmem:[#allocation2 + $0xa0] sm:$0xff]  ;;  %v100_v52 = vpack.c.bf16 %v85_v48, %v82_v47  ;;  %v87_v54 = vld [vmem:[#allocation2 + $0x90] sm:$0xff]  ;;  %v90_v55 = vld [vmem:[#allocation2 + $0xa8] sm:$0xff] }
  0x1e   :  { %v104_v53 = vpack.c.bf16 %v92_v50, %v89_v49  ;;  %v88_v56 = vld [vmem:[#allocation2 + $0x98] sm:$0xff]  ;;  %v91_v57 = vld [vmem:[#allocation2 + $0xb0] sm:$0xff]  ;;  %v102_v58 = vpack.c.bf16 %v90_v55, %v87_v54  ;;  %v717_v60 = vld [vmem:[#allocation7 + $0x28] sm:$0xff] }
  0x1f   :  { %v103_v59 = vpack.c.bf16 %v91_v57, %v88_v56  ;;  %v716_v61 = vld [vmem:[#allocation7 + $0x20] sm:$0xff]  ;;  %v715_v62 = vld [vmem:[#allocation7 + $0x18] sm:$0xff]  ;;  %v714_v63 = vld [vmem:[#allocation7 + $0x10] sm:$0xff] }
  0x20   :  { %281 = vmatpush.bf16.msra.mxu0 %v696_v16  ;;  %657 = vmatmul.msk.bf16.vlgmr.msra.gmra.mxu2 %vm260_vm1, %v95_v18  ;;  %v713_v0 = vld [vmem:[#allocation7 + $0x8] sm:$0xff]  ;;  %v712_v1 = vld [vmem:[#allocation7] sm:$0xff] }
  0x21   :  { %310 = vmatpush.bf16.msra.mxu1 %v704_v17  ;;  %445 = vmatpush.bf16.msra.mxu3 %v718_v44  ;;  %v751_v3 = vld [vmem:[%s958_s2] ss:$0 sm:$0xff] }
  0x24   :  { %282 = vmatpush.bf16.msra.mxu0 %v695_v19 }
  0x25   :  { %311 = vmatpush.bf16.msra.mxu1 %v703_v20  ;;  %446 = vmatpush.bf16.msra.mxu3 %v717_v60 }
  0x28   :  { %283 = vmatpush.bf16.msra.mxu0 %v694_v21 }
  0x29   :  { %312 = vmatpush.bf16.msra.mxu1 %v702_v22  ;;  %447 = vmatpush.bf16.msra.mxu3 %v716_v61 }
  0x2c   :  { %284 = vmatpush.bf16.msra.mxu0 %v693_v23 }
  0x2d   :  { %313 = vmatpush.bf16.msra.mxu1 %v701_v24  ;;  %448 = vmatpush.bf16.msra.mxu3 %v715_v62 }
  0x2f   :  { %285 = vmatmul.bf16.vlgmr.msra.gmra.mxu0 %v93_v31 }
  0x30   :  { %314 = vmatmul.bf16.vlgmr.msra.gmra.mxu1 %v94_v32  ;;  %658 = vmatmul.msk.bf16.gmra.mxu2 %vm260_vm1, %v98_v33 }
  0x31   :  { %449 = vmatpush.bf16.msra.mxu3 %v714_v63  ;;  %v752_v63 = vld [vmem:[%s960_s4] ss:$0 sm:$0xff]  ;;  %s894_s4 = smov [#allocation8]  }
  0x32   :  { %s565_s12 = sshll.u32 %s894_s4, 4  ;;  %s566_s12 = int_to_ptr.vmem [resolvable:$true] %s565_s12 }
  0x35   :  { %450 = vmatpush.bf16.msra.mxu3 %v713_v0 }
  0x39   :  { %451 = vmatpush.bf16.msra.mxu3 %v712_v1 }
  0x3f   :  { %290 = vmatmul.bf16.gmra.mxu0 %v96_v40 }
  0x40   :  { %319 = vmatmul.bf16.gmra.mxu1 %v97_v41  ;;  %659 = vmatmul.msk.bf16.gmra.mxu2 %vm260_vm1, %v101_v42 }
  0x4f   :  { %295 = vmatmul.bf16.gmra.mxu0 %v99_v51 }
  0x50   :  { %324 = vmatmul.bf16.gmra.mxu1 %v100_v52  ;;  %660 = vmatmul.msk.bf16.gmra.mxu2 %vm260_vm1, %v104_v53 }
  0x5f   :  { %300 = vmatmul.bf16.gmra.mxu0 %v102_v58 }
  0x60   :  { %329 = vmatmul.bf16.gmra.mxu1 %v103_v59 }
  0xa3   :  { %v344_v2 = vpop.f32.mrf.mxu2 }
  0xab   :  { %v346_v6 = vpop.f32.mrf.mxu2 }
  0xac   :  { %v286_v4 = vpop.f32.mrf.mxu0 }
  0xad   :  { %v315_v5 = vpop.f32.mrf.mxu1  ;;  %v287_v7 = vadd.f32 %v751_v3, %v286_v4 }
  0xaf   :  { %v316_v8 = vadd.f32 %v315_v5, %v287_v7 }
  0xb1   :  { %v345_v13 = vadd.f32 %v344_v2, %v316_v8 }
  0xb3   :  { %v349_v12 = vpop.f32.mrf.mxu2  ;;  %v364_v16 = vmax.f32 %v345_v13, 0.0 }
  0xb4   :  { %v288_v9 = vpop.f32.mrf.mxu0 }
  0xb5   :  { %v317_v10 = vpop.f32.mrf.mxu1  ;;  %v289_v11 = vadd.f32 %v751_v3, %v288_v9 }
  0xb7   :  { %v318_v14 = vadd.f32 %v317_v10, %v289_v11 }
  0xb9   :  { %v347_v15 = vadd.f32 %v346_v6, %v318_v14 }
  0xbb   :  { %v365_v17 = vmax.f32 %v347_v15, 0.0  ;;  %v351_v22 = vpop.f32.mrf.mxu2 }
  0xbc   :  { %v291_v18 = vpop.f32.mrf.mxu0 }
  0xbd   :  { %v320_v19 = vpop.f32.mrf.mxu1  ;;  %v372_v20 = vpack.c.bf16 %v365_v17, %v364_v16  ;;  %v292_v21 = vadd.f32 %v751_v3, %v291_v18 }
  0xbf   :  { %452 = vmatmul.bf16.vlgmr.msra.gmra.mxu3 %v372_v20  ;;  %v321_v23 = vadd.f32 %v320_v19, %v292_v21 }
  0xc1   :  { %v350_v27 = vadd.f32 %v349_v12, %v321_v23 }
  0xc3   :  { %v354_v30 = vpop.f32.mrf.mxu2  ;;  %v366_v31 = vmax.f32 %v350_v27, 0.0 }
  0xc4   :  { %v293_v24 = vpop.f32.mrf.mxu0 }
  0xc5   :  { %v322_v25 = vpop.f32.mrf.mxu1  ;;  %v294_v26 = vadd.f32 %v751_v3, %v293_v24 }
  0xc7   :  { %v323_v28 = vadd.f32 %v322_v25, %v294_v26 }
  0xc9   :  { %v352_v29 = vadd.f32 %v351_v22, %v323_v28 }
  0xcb   :  { %v367_v32 = vmax.f32 %v352_v29, 0.0  ;;  %v356_v38 = vpop.f32.mrf.mxu2 }
  0xcc   :  { %v296_v33 = vpop.f32.mrf.mxu0 }
  0xcd   :  { %v325_v34 = vpop.f32.mrf.mxu1  ;;  %v373_v35 = vpack.c.bf16 %v367_v32, %v366_v31  ;;  %v297_v36 = vadd.f32 %v751_v3, %v296_v33 }
  0xcf   :  { %457 = vmatmul.bf16.gmra.mxu3 %v373_v35  ;;  %v326_v37 = vadd.f32 %v325_v34, %v297_v36 }
  0xd1   :  { %v355_v42 = vadd.f32 %v354_v30, %v326_v37 }
  0xd3   :  { %v368_v45 = vmax.f32 %v355_v42, 0.0  ;;  %v359_v50 = vpop.f32.mrf.mxu2 }
  0xd4   :  { %v298_v39 = vpop.f32.mrf.mxu0 }
  0xd5   :  { %v327_v40 = vpop.f32.mrf.mxu1  ;;  %v299_v41 = vadd.f32 %v751_v3, %v298_v39 }
  0xd7   :  { %v328_v43 = vadd.f32 %v327_v40, %v299_v41 }
  0xd9   :  { %v357_v44 = vadd.f32 %v356_v38, %v328_v43 }
  0xdb   :  { %v369_v46 = vmax.f32 %v357_v44, 0.0  ;;  %v361_v58 = vpop.f32.mrf.mxu2 }
  0xdc   :  { %v301_v47 = vpop.f32.mrf.mxu0 }
  0xdd   :  { %v330_v48 = vpop.f32.mrf.mxu1  ;;  %v374_v49 = vpack.c.bf16 %v369_v46, %v368_v45  ;;  %v302_v51 = vadd.f32 %v751_v3, %v301_v47 }
  0xdf   :  { %462 = vmatmul.bf16.gmra.mxu3 %v374_v49  ;;  %v331_v52 = vadd.f32 %v330_v48, %v302_v51 }
  0xe1   :  { %v360_v56 = vadd.f32 %v359_v50, %v331_v52 }
  0xe3   :  { %v370_v60 = vmax.f32 %v360_v56, 0.0 }
  0xe4   :  { %v303_v53 = vpop.f32.mrf.mxu0 }
  0xe5   :  { %v304_v54 = vadd.f32 %v751_v3, %v303_v53  ;;  %v332_v55 = vpop.f32.mrf.mxu1 }
  0xe7   :  { %v333_v57 = vadd.f32 %v332_v55, %v304_v54 }
  0xe9   :  { %v362_v59 = vadd.f32 %v361_v58, %v333_v57 }
  0xeb   :  { %v371_v61 = vmax.f32 %v362_v59, 0.0 }
  0xed   :  { %v375_v62 = vpack.c.bf16 %v371_v61, %v370_v60 }
  0xef   :  { %467 = vmatmul.bf16.gmra.mxu3 %v375_v62 }
 0x142   :  { %v453_v0 = vpop.f32.mrf.mxu3 }
 0x143   :  { %v454_v1 = vadd.f32 %v752_v63, %v453_v0 }
 0x145   :  { %473 = vmax.xlane.f32.xlu0 %v454_v1 }
 0x14a   :  { %v455_v2 = vpop.f32.mrf.mxu3 }
 0x14b   :  { %v456_v4 = vadd.f32 %v752_v63, %v455_v2 }
 0x14d   :  { %475 = vmax.xlane.f32.xlu0 %v456_v4 }
 0x152   :  { %v458_v3 = vpop.f32.mrf.mxu3 }
 0x153   :  { %v459_v5 = vadd.f32 %v752_v63, %v458_v3 }
 0x155   :  { %477 = vmax.xlane.f32.xlu1 %v459_v5 }
 0x15a   :  { %v460_v6 = vpop.f32.mrf.mxu3 }
 0x15b   :  { %v461_v7 = vadd.f32 %v752_v63, %v460_v6 }
 0x15d   :  { %479 = vmax.xlane.f32.xlu1 %v461_v7 }
 0x162   :  { %v463_v8 = vpop.f32.mrf.mxu3 }
 0x163   :  { %v464_v9 = vadd.f32 %v752_v63, %v463_v8 }
 0x165   :  { %481 = vmax.xlane.f32.xlu2 %v464_v9 }
 0x16a   :  { %v465_v10 = vpop.f32.mrf.mxu3 }
 0x16b   :  { %v466_v11 = vadd.f32 %v752_v63, %v465_v10 }
 0x16d   :  { %483 = vmax.xlane.f32.xlu2 %v466_v11 }
 0x172   :  { %v468_v12 = vpop.f32.mrf.mxu3 }
 0x173   :  { %v469_v13 = vadd.f32 %v752_v63, %v468_v12 }
 0x175   :  { %485 = vmax.xlane.f32.xlu0 %v469_v13 }
 0x17a   :  { %v470_v14 = vpop.f32.mrf.mxu3 }
 0x17b   :  { %v471_v15 = vadd.f32 %v752_v63, %v470_v14 }
 0x17d   :  { %487 = vmax.xlane.f32.xlu1 %v471_v15 }
 0x1b8   :  { %v474_v16 = vpop.xlane.xlu0 %473 }
 0x1b9   :  { %v489_v17 = vsub.f32 %v454_v1, %v474_v16 }
 0x1bb   :  { %v497_v18 = vmul.f32 1.442695, %v489_v17 }
 0x1bd   :  { %753 = vpow2.f32 %v497_v18 }
 0x1c0   :  { %v476_v19 = vpop.xlane.xlu0 %475 }
 0x1c1   :  { %v490_v20 = vsub.f32 %v456_v4, %v476_v19 }
 0x1c3   :  { %v754_v21 = vpop.eup %753  ;;  %v499_v22 = vmul.f32 1.442695, %v490_v20 }
 0x1c4   :  { %513 = vadd.xlane.f32.xlu2 %v754_v21 }
 0x1c5   :  { %755 = vpow2.f32 %v499_v22 }
 0x1c8   :  { %v478_v23 = vpop.xlane.xlu1 %477 }
 0x1c9   :  { %v491_v24 = vsub.f32 %v459_v5, %v478_v23 }
 0x1cb   :  { %v756_v25 = vpop.eup %755  ;;  %v501_v26 = vmul.f32 1.442695, %v491_v24 }
 0x1cc   :  { %515 = vadd.xlane.f32.xlu0 %v756_v25 }
 0x1cd   :  { %757 = vpow2.f32 %v501_v26 }
 0x1d0   :  { %v480_v27 = vpop.xlane.xlu1 %479 }
 0x1d1   :  { %v492_v28 = vsub.f32 %v461_v7, %v480_v27 }
 0x1d3   :  { %v758_v29 = vpop.eup %757  ;;  %v503_v30 = vmul.f32 1.442695, %v492_v28 }
 0x1d4   :  { %517 = vadd.xlane.f32.xlu1 %v758_v29 }
 0x1d5   :  { %759 = vpow2.f32 %v503_v30 }
 0x1d8   :  { %v482_v31 = vpop.xlane.xlu2 %481 }
 0x1d9   :  { %v493_v32 = vsub.f32 %v464_v9, %v482_v31 }
 0x1db   :  { %v760_v33 = vpop.eup %759  ;;  %v505_v34 = vmul.f32 1.442695, %v493_v32 }
 0x1dc   :  { %519 = vadd.xlane.f32.xlu2 %v760_v33 }
 0x1dd   :  { %761 = vpow2.f32 %v505_v34 }
 0x1e0   :  { %v484_v35 = vpop.xlane.xlu2 %483 }
 0x1e1   :  { %v494_v36 = vsub.f32 %v466_v11, %v484_v35 }
 0x1e3   :  { %v762_v37 = vpop.eup %761  ;;  %v507_v38 = vmul.f32 1.442695, %v494_v36 }
 0x1e4   :  { %521 = vadd.xlane.f32.xlu0 %v762_v37 }
 0x1e5   :  { %763 = vpow2.f32 %v507_v38 }
 0x1e8   :  { %v486_v39 = vpop.xlane.xlu0 %485 }
 0x1e9   :  { %v495_v40 = vsub.f32 %v469_v13, %v486_v39 }
 0x1eb   :  { %v764_v41 = vpop.eup %763  ;;  %v509_v42 = vmul.f32 1.442695, %v495_v40 }
 0x1ec   :  { %523 = vadd.xlane.f32.xlu1 %v764_v41 }
 0x1ed   :  { %765 = vpow2.f32 %v509_v42 }
 0x1f0   :  { %v488_v43 = vpop.xlane.xlu1 %487 }
 0x1f1   :  { %v496_v44 = vsub.f32 %v471_v15, %v488_v43 }
 0x1f3   :  { %v766_v45 = vpop.eup %765  ;;  %v511_v46 = vmul.f32 1.442695, %v496_v44 }
 0x1f4   :  { %525 = vadd.xlane.f32.xlu2 %v766_v45 }
 0x1f5   :  { %767 = vpow2.f32 %v511_v46 }
 0x1fb   :  { %v768_v47 = vpop.eup %767 }
 0x1fc   :  { %527 = vadd.xlane.f32.xlu0 %v768_v47 }
 0x237   :  { %v514_v48 = vpop.xlane.xlu2 %513 }
 0x238   :  { %769 = vrcp.f32 %v514_v48 }
 0x23e   :  { %v770_v50 = vpop.eup %769 }
 0x23f   :  { %v516_v49 = vpop.xlane.xlu0 %515  ;;  %v537_v52 = vmul.f32 %v770_v50, %v754_v21 }
 0x240   :  { %771 = vrcp.f32 %v516_v49 }
 0x246   :  { %v772_v51 = vpop.eup %771 }
 0x247   :  { %v538_v53 = vmul.f32 %v772_v51, %v756_v25  ;;  %v518_v55 = vpop.xlane.xlu1 %517 }
 0x248   :  { %773 = vrcp.f32 %v518_v55 }
 0x249   :  { %v723_v54 = vpack.c.bf16 %v538_v53, %v537_v52 }
 0x24b   :  { %724 = vst [vmem:[#allocation8] sm:$0xff] %v723_v54  }
 0x24e   :  { %v774_v57 = vpop.eup %773 }
 0x24f   :  { %v520_v56 = vpop.xlane.xlu2 %519  ;;  %v539_v59 = vmul.f32 %v774_v57, %v758_v29 }
 0x250   :  { %775 = vrcp.f32 %v520_v56 }
 0x256   :  { %v776_v58 = vpop.eup %775 }
 0x257   :  { %v540_v60 = vmul.f32 %v776_v58, %v760_v33  ;;  %v522_v62 = vpop.xlane.xlu0 %521 }
 0x258   :  { %777 = vrcp.f32 %v522_v62 }
 0x259   :  { %v728_v61 = vpack.c.bf16 %v540_v60, %v539_v59 }
 0x25b   :  { %740 = vst [vmem:[#allocation8 + $0x8] sm:$0xff] %v728_v61  }
 0x25e   :  { %v778_v0 = vpop.eup %777 }
 0x25f   :  { %v524_v63 = vpop.xlane.xlu1 %523  ;;  %v541_v2 = vmul.f32 %v778_v0, %v762_v37 }
 0x260   :  { %779 = vrcp.f32 %v524_v63 }
 0x266   :  { %v780_v1 = vpop.eup %779 }
 0x267   :  { %v542_v4 = vmul.f32 %v780_v1, %v764_v41  ;;  %v526_v5 = vpop.xlane.xlu2 %525 }
 0x268   :  { %781 = vrcp.f32 %v526_v5 }
 0x269   :  { %v733_v3 = vpack.c.bf16 %v542_v4, %v541_v2 }
 0x26b   :  { %741 = vst [vmem:[#allocation8 + $0x10] sm:$0xff] %v733_v3  }
 0x26e   :  { %v782_v7 = vpop.eup %781 }
 0x26f   :  { %v528_v6 = vpop.xlane.xlu0 %527  ;;  %v543_v9 = vmul.f32 %v782_v7, %v766_v45 }
 0x270   :  { %783 = vrcp.f32 %v528_v6 }
 0x276   :  { %v784_v8 = vpop.eup %783 }
 0x277   :  { %v544_v10 = vmul.f32 %v784_v8, %v768_v47 }
 0x279   :  { %v738_v11 = vpack.c.bf16 %v544_v10, %v543_v9 }
 0x27b   :  { %742 = vst [vmem:[#allocation8 + $0x18] sm:$0xff] %v738_v11  }
 0x27c   :  { %573 = dma.vmem_to_hbm [thread:$0]  %s566_s12, 512, %s568_s15, [#allocation4], %s888_s26, %s888_s26, %s889_s27  }
 0x27d   :  { %885 = dma.done.wait [#allocation4], 512  }
 0x27e   :  { %886 = vsyncadd [#allocation4], 4294966784 }
 0x27f   :  { %578 = vsyncpa [#allocation3], 1 }
 0x280   :  { %579 = vsyncpa [#allocation6], 1 }
 0x281   :  { %580 = vsyncpa [#allocation4], 1 }

</bundles_post_ra>
